<compile_context>
chip_gen: v7x
topology: tpu7x:2x2x1
jax: 0.10.0
libtpu: 0.0.40
codegen_flags: <defaults>
</compile_context>

<pallas_src>
import functools

import jax
import jax.numpy as jnp
from jax.experimental import pallas as pl
from jax.experimental.pallas import tpu as pltpu  # noqa: F401  (TPU backend)


def _apply_activation(y, activation):
    if activation == "relu":
        return jnp.maximum(y, 0.0)
    if activation == "tanh":
        return jnp.tanh(y)
    if activation == "linear":
        return y
    raise ValueError(f"unknown activation: {activation}")


# ---------------------------------------------------------------------------
# Fused MLP kernel: the entire layer stack in one pallas_call.
# refs = (x_ref, w0_ref, b0_ref, w1_ref, b1_ref, ..., o_ref)
# ---------------------------------------------------------------------------
def _fused_mlp_kernel(*refs, activations):
    x_ref, o_ref = refs[0], refs[-1]
    p = refs[1:-1]
    n_layers = len(activations)
    compute_dtype = p[0].dtype                  # weight storage dtype (bf16/f32)
    z = x_ref[...].astype(compute_dtype)        # single input cast (tiny tile)
    for i, act in enumerate(activations):
        w = p[2 * i][...]                       # (K, H)  bf16 or f32
        b = p[2 * i + 1][...]                   # (1, H)  f32
        y = jnp.dot(z, w, preferred_element_type=jnp.float32)   # f32 accumulate
        z = _apply_activation(y + b, act)       # epilogue stays f32 (v5e VPU/EUP)
        if i + 1 < n_layers:
            z = z.astype(compute_dtype)         # feed next matmul in weight dtype
    o_ref[...] = z.astype(o_ref.dtype)          # single store of (N, out_dim)


def _fused_forward(z4d, params, *, activations, out_dim):
    n = z4d.shape[0]
    # nn.Flatten(): (N, C, H, W) -> (N, C*H*W); metadata-only reshape under jit.
    z = z4d.reshape(n, -1)
    if z.dtype != jnp.float32:
        z = z.astype(jnp.float32)

    flat_params = []
    # Full-array blocks everywhere: block shape == array dims is always legal,
    # so no lane/sublane padding is needed for these small widths.
    in_specs = [pl.BlockSpec(z.shape, lambda: (0, 0))]
    for w, b in params:
        flat_params += [w, b]
        in_specs += [pl.BlockSpec(w.shape, lambda: (0, 0)),
                     pl.BlockSpec(b.shape, lambda: (0, 0))]

    return pl.pallas_call(
        functools.partial(_fused_mlp_kernel, activations=activations),
        out_shape=jax.ShapeDtypeStruct((n, out_dim), jnp.float32),
        grid=(),
        in_specs=in_specs,
        out_specs=pl.BlockSpec((n, out_dim), lambda: (0, 0)),
    )(z, *flat_params)


class NeuralNetworkPallas:
    """Flatten + Sequential(dense / lowrank layers), fused into one kernel."""

    def __init__(self, config, key, param_dtype=jnp.bfloat16):
        self._lr = config["settings"]["learning_rate"]
        self.contains_lowrank = False
        self.layers = []          # original (unfolded) f32 params, for reference

        fused = []                # (w, b, activation) after low-rank folding
        for layer_cfg in config["layer"]:
            kind = layer_cfg["type"]
            act = layer_cfg["activation"]
            fan_in, fan_out = layer_cfg["in"], layer_cfg["out"]
            if kind == "dense":
                key, kw, kb = jax.random.split(key, 3)
                w = jax.random.normal(kw, (fan_in, fan_out), jnp.float32) * 0.05
                b = jax.random.normal(kb, (1, fan_out), jnp.float32) * 0.05
                self.layers.append(("dense", (w, b), act))
                fused.append((w, b, act))
            elif kind == "lowrank":
                r = layer_cfg["rank"]
                key, ku, kv, kb = jax.random.split(key, 4)
                u = jax.random.normal(ku, (fan_in, r), jnp.float32) * 0.05
                v = jax.random.normal(kv, (r, fan_out), jnp.float32) * 0.05
                b = jax.random.normal(kb, (1, fan_out), jnp.float32) * 0.05
                self.layers.append(("lowrank", (u, v, b), act))
                self.contains_lowrank = True
                if r < 128:
                    # constant-fold (x@U)@V -> x@(U@V): a rank<<128 second MXU
                    # pass would leave >95% of the systolic array idle.
                    fused.append((u @ v, b, act))
                else:
                    fused.append((u, jnp.zeros((1, r), jnp.float32), "linear"))
                    fused.append((v, b, act))
            else:
                # TODO(synk): other LayerFactory layer types (e.g. conv) not in
                # this config are not implemented.
                raise ValueError(f"unsupported layer type: {kind}")

        self._out_dim = config["layer"][-1]["out"]

        # Weights stored in param_dtype (bf16 default: native MXU path on
        # v5e/v6e/v7x, halves the dominant w0 DMA); biases/epilogue stay f32.
        params, activations = [], []
        for w, b, act in fused:
            params.append((w.astype(param_dtype), b.astype(jnp.float32)))
            activations.append(act)
        self._params = tuple(params)

        self._forward = jax.jit(functools.partial(
            _fused_forward, activations=tuple(activations),
            out_dim=self._out_dim))

    def __call__(self, z):
        return self._forward(z, self._params)


# ---------------------------------------------------------------------------
# main
# ---------------------------------------------------------------------------
if __name__ == "__main__":
    N, C, H, W = 2, 4, 16, 16
    F = C * H * W  # 1024

    config = {
        "settings": {"learning_rate": 1e-3},
        "layer": [
            {"type": "dense",   "activation": "relu",   "in": F,  "out": 32},
            {"type": "lowrank", "activation": "relu",   "in": 32, "out": 32, "rank": 8},
            {"type": "dense",   "activation": "linear", "in": 32, "out": 10},
        ],
    }

    key = jax.random.PRNGKey(0)
    key, kx, kp = jax.random.split(key, 3)
    x = jax.random.normal(kx, (N, C, H, W), jnp.float32)

    # default: bf16 weight storage, f32 accumulate + epilogue
    net = NeuralNetworkPallas(config, kp)
    out = jax.block_until_ready(net(x))

    # reference in plain JAX using the ORIGINAL (unfolded, f32) params
    zf = x.reshape(N, -1)
    (w0, b0) = net.layers[0][1]
    (u1, v1, b1) = net.layers[1][1]
    (w2, b2) = net.layers[2][1]
    ref = jnp.maximum(zf @ w0 + b0, 0.0)
    ref = jnp.maximum((ref @ u1) @ v1 + b1, 0.0)
    ref = ref @ w2 + b2

    assert out.shape == (N, 10)
    assert jnp.allclose(out, ref, atol=5e-2, rtol=5e-2)   # bf16 weights, K=1024

    # f32-weight variant (same key -> same params), tight tolerance
    net_f32 = NeuralNetworkPallas(config, kp, param_dtype=jnp.float32)
    out_f32 = jax.block_until_ready(net_f32(x))
    assert out_f32.shape == (N, 10)
    assert jnp.allclose(out_f32, ref, atol=1e-4, rtol=1e-4)

    print("KERNEL_OK")
</pallas_src>

<mosaic_0001>
module attributes {stable_mosaic.version = 11 : i64} {
  func.func @_fused_mlp_kernel(%arg0: memref<2x1024xf32, #tpu.memory_space<vmem>>, %arg1: memref<1024x32xbf16, #tpu.memory_space<vmem>>, %arg2: memref<1x32xf32, #tpu.memory_space<vmem>>, %arg3: memref<32x32xbf16, #tpu.memory_space<vmem>>, %arg4: memref<1x32xf32, #tpu.memory_space<vmem>>, %arg5: memref<32x10xbf16, #tpu.memory_space<vmem>>, %arg6: memref<1x10xf32, #tpu.memory_space<vmem>>, %arg7: memref<2x10xf32, #tpu.memory_space<vmem>>) attributes {dimension_semantics = [], scalar_prefetch = 0 : i64, scratch_operands = 0 : i64, tpu.core_type = #tpu.core_type<tc>} {
    %c0 = arith.constant 0 : index
    %c0_0 = arith.constant 0 : index
    %0 = vector.load %arg0[%c0, %c0_0] : memref<2x1024xf32, #tpu.memory_space<vmem>>, vector<2x1024xf32>
    %1 = arith.truncf %0 : vector<2x1024xf32> to vector<2x1024xbf16>
    %c0_1 = arith.constant 0 : index
    %c0_2 = arith.constant 0 : index
    %2 = vector.load %arg1[%c0_1, %c0_2] : memref<1024x32xbf16, #tpu.memory_space<vmem>>, vector<1024x32xbf16>
    %c0_3 = arith.constant 0 : index
    %c0_4 = arith.constant 0 : index
    %3 = vector.load %arg2[%c0_3, %c0_4] : memref<1x32xf32, #tpu.memory_space<vmem>>, vector<1x32xf32>
    %cst = arith.constant dense<0.000000e+00> : vector<2x32xf32>
    %4 = tpu.matmul %1, %2, %cst {dimension_numbers = #tpu.dot_dimension_numbers<[1], [0], [0], [1], [0, 0, 1, 1], [], []>} : vector<2x1024xbf16>, vector<1024x32xbf16>, vector<2x32xf32> -> vector<2x32xf32>
    %5 = vector.broadcast %3 : vector<1x32xf32> to vector<2x32xf32>
    %6 = arith.addf %4, %5 : vector<2x32xf32>
    %cst_5 = arith.constant 0.000000e+00 : f32
    %7 = vector.broadcast %cst_5 : f32 to vector<2x32xf32>
    %8 = arith.maximumf %6, %7 : vector<2x32xf32>
    %9 = arith.truncf %8 : vector<2x32xf32> to vector<2x32xbf16>
    %c0_6 = arith.constant 0 : index
    %c0_7 = arith.constant 0 : index
    %10 = vector.load %arg3[%c0_6, %c0_7] : memref<32x32xbf16, #tpu.memory_space<vmem>>, vector<32x32xbf16>
    %c0_8 = arith.constant 0 : index
    %c0_9 = arith.constant 0 : index
    %11 = vector.load %arg4[%c0_8, %c0_9] : memref<1x32xf32, #tpu.memory_space<vmem>>, vector<1x32xf32>
    %cst_10 = arith.constant dense<0.000000e+00> : vector<2x32xf32>
    %12 = tpu.matmul %9, %10, %cst_10 {dimension_numbers = #tpu.dot_dimension_numbers<[1], [0], [0], [1], [0, 0, 1, 1], [], []>} : vector<2x32xbf16>, vector<32x32xbf16>, vector<2x32xf32> -> vector<2x32xf32>
    %13 = vector.broadcast %11 : vector<1x32xf32> to vector<2x32xf32>
    %14 = arith.addf %12, %13 : vector<2x32xf32>
    %cst_11 = arith.constant 0.000000e+00 : f32
    %15 = vector.broadcast %cst_11 : f32 to vector<2x32xf32>
    %16 = arith.maximumf %14, %15 : vector<2x32xf32>
    %17 = arith.truncf %16 : vector<2x32xf32> to vector<2x32xbf16>
    %c0_12 = arith.constant 0 : index
    %c0_13 = arith.constant 0 : index
    %18 = vector.load %arg5[%c0_12, %c0_13] : memref<32x10xbf16, #tpu.memory_space<vmem>>, vector<32x10xbf16>
    %c0_14 = arith.constant 0 : index
    %c0_15 = arith.constant 0 : index
    %19 = vector.load %arg6[%c0_14, %c0_15] : memref<1x10xf32, #tpu.memory_space<vmem>>, vector<1x10xf32>
    %cst_16 = arith.constant dense<0.000000e+00> : vector<2x10xf32>
    %20 = tpu.matmul %17, %18, %cst_16 {dimension_numbers = #tpu.dot_dimension_numbers<[1], [0], [0], [1], [0, 0, 1, 1], [], []>} : vector<2x32xbf16>, vector<32x10xbf16>, vector<2x10xf32> -> vector<2x10xf32>
    %21 = vector.broadcast %19 : vector<1x10xf32> to vector<2x10xf32>
    %22 = arith.addf %20, %21 : vector<2x10xf32>
    %c0_17 = arith.constant 0 : index
    %c0_18 = arith.constant 0 : index
    %23 = vector.load %arg7[%c0_17, %c0_18] : memref<2x10xf32, #tpu.memory_space<vmem>>, vector<2x10xf32>
    tpu.vector_store %arg7[%c0_17, %c0_18], %22 {strides = array<i32>} : memref<2x10xf32, #tpu.memory_space<vmem>>, vector<2x10xf32>,
    return
  }
}

</mosaic_0001>

<bundles_post_ra>
// kernel: _fused_forward.1
= control target key start
LH: loop header
LB: loop body
LE: loop exit
PB: predicated region body
PF: predicated region fallthrough
CT: control target
= control target key end

     0   :  { %v36_v28 = vlaneseq  ;;  %v1195_v36 = vmov 1983009808   ;;  %s1476_s0 = inlined_call_operand.vmem [shape: f32[2,1024], index: 0, kind: input, shape index: {}]   ;;  %s1477_s1 = inlined_call_operand.vmem [shape: bf16[1024,32], index: 1, kind: input, shape index: {}]   ;;  %s1478_s2 = inlined_call_operand.vmem [shape: f32[1,32], index: 2, kind: input, shape index: {}]   ;;  %s1479_s3 = inlined_call_operand.vmem [shape: bf16[32,32], index: 3, kind: input, shape index: {}]   ;;  %s1480_s4 = inlined_call_operand.vmem [shape: f32[1,32], index: 4, kind: input, shape index: {}]   ;;  %s1481_s5 = inlined_call_operand.vmem [shape: bf16[32,10], index: 5, kind: input, shape index: {}]   ;;  %s1482_s6 = inlined_call_operand.vmem [shape: f32[1,10], index: 6, kind: input, shape index: {}]   ;;  %s1483_s7 = inlined_call_operand.hbm [shape: f32[2,10], index: 7, kind: output, shape index: {}]  }
   0x1   :  { %v1101_v0 = vld [vmem:[%s1477_s1 + $0x40] sm:$0xff]   ;;  %v1105_v4 = vld [vmem:[%s1477_s1 + $0x48] sm:$0xff]   ;;  %v1109_v8 = vld [vmem:[%s1477_s1 + $0x50] sm:$0xff]   ;;  %v34_v37 = vunpack.c.l.s4 %v1195_v36 }
   0x2   :  { %v1102_v1 = vld [vmem:[%s1477_s1 + $0xc0] sm:$0xff]   ;;  %987 = vmatprep.subr.bf16.mxu0 %v1101_v0  ;;  %v1106_v5 = vld [vmem:[%s1477_s1 + $0xc8] sm:$0xff]   ;;  %v1110_v9 = vld [vmem:[%s1477_s1 + $0xd0] sm:$0xff]   ;;  %v37_v33 = vshrl.u32 %v36_v28, 7 }
   0x3   :  { %v1103_v2 = vld [vmem:[%s1477_s1] sm:$0xff]   ;;  %1009 = vmatprep.subr.bf16.mxu1 %v1102_v1  ;;  %v1107_v6 = vld [vmem:[%s1477_s1 + $0x8] sm:$0xff]   ;;  %v1111_v10 = vld [vmem:[%s1477_s1 + $0x10] sm:$0xff]   ;;  %v35_v39 = vunpack.c.0.s8 %v34_v37 }
   0x4   :  { %v1104_v3 = vld [vmem:[%s1477_s1 + $0x80] sm:$0xff]   ;;  %988 = vmatpush3.bf16.msra.mxu0 %v1103_v2  ;;  %v1108_v7 = vld [vmem:[%s1477_s1 + $0x88] sm:$0xff]   ;;  %v1112_v11 = vld [vmem:[%s1477_s1 + $0x90] sm:$0xff]  }
   0x5   :  { %1010 = vmatpush3.bf16.msra.mxu1 %v1104_v3  ;;  %989 = vmatprep.subr.bf16.mxu0 %v1105_v4  ;;  %v1113_v12 = vld [vmem:[%s1477_s1 + $0x58] sm:$0xff]   ;;  %v1117_v16 = vld [vmem:[%s1477_s1 + $0x60] sm:$0xff]   ;;  %v1121_v20 = vld [vmem:[%s1477_s1 + $0x68] sm:$0xff]   ;;  %v1344_v41 = vsub.s32 %v35_v39, %v37_v33 }
   0x6   :  { %1011 = vmatprep.subr.bf16.mxu1 %v1106_v5  ;;  %v1114_v13 = vld [vmem:[%s1477_s1 + $0xd8] sm:$0xff]   ;;  %v1118_v17 = vld [vmem:[%s1477_s1 + $0xe0] sm:$0xff]   ;;  %v1122_v21 = vld [vmem:[%s1477_s1 + $0xe8] sm:$0xff]  }
   0x7   :  { %v1115_v14 = vld [vmem:[%s1477_s1 + $0x18] sm:$0xff]   ;;  %v1119_v18 = vld [vmem:[%s1477_s1 + $0x20] sm:$0xff]   ;;  %v1123_v22 = vld [vmem:[%s1477_s1 + $0x28] sm:$0xff]  }
   0x8   :  { %990 = vmatpush3.bf16.msra.mxu0 %v1107_v6  ;;  %v1116_v15 = vld [vmem:[%s1477_s1 + $0x98] sm:$0xff]   ;;  %v1120_v19 = vld [vmem:[%s1477_s1 + $0xa0] sm:$0xff]   ;;  %v1124_v23 = vld [vmem:[%s1477_s1 + $0xa8] sm:$0xff]  }
   0x9   :  { %1012 = vmatpush3.bf16.msra.mxu1 %v1108_v7  ;;  %991 = vmatprep.subr.bf16.mxu0 %v1109_v8  ;;  %v1125_v24 = vld [vmem:[%s1477_s1 + $0x70] sm:$0xff]   ;;  %v1129_v29 = vld [vmem:[%s1477_s1 + $0x78] sm:$0xff]   ;;  %v28_v34 = vld [vmem:[%s1476_s0] sm:$0xff] }
   0xa   :  { %1013 = vmatprep.subr.bf16.mxu1 %v1110_v9  ;;  %v1126_v25 = vld [vmem:[%s1477_s1 + $0xf0] sm:$0xff]   ;;  %v1130_v30 = vld [vmem:[%s1477_s1 + $0xf8] sm:$0xff]   ;;  %v1134_v35 = vld [vmem:[%s1477_s1 + $0x140] sm:$0xff]   ;;  %v32_v40 = vcombine.high %v28_v34, %v28_v34  ;;  %v39_v42 = vrot.slane %v28_v34, %v1344_v41 }
   0xb   :  { %v1127_v26 = vld [vmem:[%s1477_s1 + $0x30] sm:$0xff]   ;;  %v1131_v31 = vld [vmem:[%s1477_s1 + $0x38] sm:$0xff]   ;;  %v1135_v38 = vld [vmem:[%s1477_s1 + $0x1c0] sm:$0xff]  }
   0xc   :  { %992 = vmatpush3.bf16.msra.mxu0 %v1111_v10  ;;  %v1128_v27 = vld [vmem:[%s1477_s1 + $0xb0] sm:$0xff]   ;;  %v1132_v32 = vld [vmem:[%s1477_s1 + $0xb8] sm:$0xff]   ;;  %v46_v43 = vrot.slane %v32_v40, %v1344_v41  ;;  %v47_v44 = vcombine.high %v39_v42, %v39_v42  ;;  %v1136_v46 = vld [vmem:[%s1477_s1 + $0x100] sm:$0xff]   ;;  %v74_v47 = vpack.c.bf16 %v39_v42, %v39_v42 }
   0xd   :  { %1014 = vmatpush3.bf16.msra.mxu1 %v1112_v11  ;;  %993 = vmatprep.subr.bf16.mxu0 %v1113_v12  ;;  %v1137_v49 = vld [vmem:[%s1477_s1 + $0x180] sm:$0xff]   ;;  %v1138_v52 = vld [vmem:[%s1477_s1 + $0x148] sm:$0xff]   ;;  %v1142_v56 = vld [vmem:[%s1477_s1 + $0x150] sm:$0xff]  }
   0xe   :  { %1015 = vmatprep.subr.bf16.mxu1 %v1114_v13  ;;  %v48_v45 = vcombine.high %v46_v43, %v46_v43  ;;  %v76_v48 = vpack.c.bf16 %v46_v43, %v46_v43  ;;  %v75_v50 = vpack.c.bf16 %v47_v44, %v47_v44  ;;  %v1139_v53 = vld [vmem:[%s1477_s1 + $0x1c8] sm:$0xff]   ;;  %v1143_v57 = vld [vmem:[%s1477_s1 + $0x1d0] sm:$0xff]   ;;  %v1146_v60 = vld [vmem:[%s1477_s1 + $0x158] sm:$0xff]  }
   0xf   :  { %v1140_v54 = vld [vmem:[%s1477_s1 + $0x108] sm:$0xff]   ;;  %v1144_v58 = vld [vmem:[%s1477_s1 + $0x110] sm:$0xff]   ;;  %v1147_v61 = vld [vmem:[%s1477_s1 + $0x1d8] sm:$0xff]  }
  0x10   :  { %994 = vmatpush3.bf16.msra.mxu0 %v1115_v14  ;;  %v77_v51 = vpack.c.bf16 %v48_v45, %v48_v45  ;;  %633 = vmatprep.mubr.bf16.mxu0 %v75_v50  ;;  %v1141_v55 = vld [vmem:[%s1477_s1 + $0x188] sm:$0xff]   ;;  %v1145_v59 = vld [vmem:[%s1477_s1 + $0x190] sm:$0xff]   ;;  %v1148_v62 = vld [vmem:[%s1477_s1 + $0x118] sm:$0xff]  }
  0x11   :  { %1016 = vmatpush3.bf16.msra.mxu1 %v1116_v15  ;;  %995 = vmatprep.subr.bf16.mxu0 %v1117_v16  ;;  %v1149_v63 = vld [vmem:[%s1477_s1 + $0x198] sm:$0xff]   ;;  %v1150_v0 = vld [vmem:[%s1477_s1 + $0x160] sm:$0xff]   ;;  %v1154_v4 = vld [vmem:[%s1477_s1 + $0x168] sm:$0xff]  }
  0x12   :  { %1017 = vmatprep.subr.bf16.mxu1 %v1118_v17  ;;  %673 = vmatprep.mubr.bf16.mxu1 %v77_v51  ;;  %v1151_v1 = vld [vmem:[%s1477_s1 + $0x1e0] sm:$0xff]   ;;  %v1155_v5 = vld [vmem:[%s1477_s1 + $0x1e8] sm:$0xff]   ;;  %v1158_v8 = vld [vmem:[%s1477_s1 + $0x170] sm:$0xff]  }
  0x13   :  { %v1152_v2 = vld [vmem:[%s1477_s1 + $0x120] sm:$0xff]   ;;  %v1156_v6 = vld [vmem:[%s1477_s1 + $0x128] sm:$0xff]   ;;  %v1159_v9 = vld [vmem:[%s1477_s1 + $0x1f0] sm:$0xff]  }
  0x14   :  { %996 = vmatpush3.bf16.msra.mxu0 %v1119_v18  ;;  %v1153_v3 = vld [vmem:[%s1477_s1 + $0x1a0] sm:$0xff]   ;;  %v1157_v7 = vld [vmem:[%s1477_s1 + $0x1a8] sm:$0xff]   ;;  %v1160_v11 = vld [vmem:[%s1477_s1 + $0x130] sm:$0xff]  }
  0x15   :  { %1018 = vmatpush3.bf16.msra.mxu1 %v1120_v19  ;;  %997 = vmatprep.subr.bf16.mxu0 %v1121_v20  ;;  %v29_v10 = vld [vmem:[%s1476_s0 + $0x8] sm:$0xff]  ;;  %v1161_v14 = vld [vmem:[%s1477_s1 + $0x1b0] sm:$0xff]  }
  0x16   :  { %1019 = vmatprep.subr.bf16.mxu1 %v1122_v21  ;;  %v56_v12 = vrot.slane %v29_v10, %v1344_v41  ;;  %v49_v13 = vcombine.high %v29_v10, %v29_v10 }
  0x18   :  { %998 = vmatpush3.bf16.msra.mxu0 %v1123_v22  ;;  %v64_v15 = vcombine.high %v56_v12, %v56_v12  ;;  %v63_v16 = vrot.slane %v49_v13, %v1344_v41 }
  0x19   :  { %1020 = vmatpush3.bf16.msra.mxu1 %v1124_v23  ;;  %999 = vmatprep.subr.bf16.mxu0 %v1125_v24 }
  0x1a   :  { %1021 = vmatprep.subr.bf16.mxu1 %v1126_v25 }
  0x1c   :  { %1000 = vmatpush3.bf16.msra.mxu0 %v1127_v26 }
  0x1d   :  { %1022 = vmatpush3.bf16.msra.mxu1 %v1128_v27  ;;  %1001 = vmatprep.subr.bf16.mxu0 %v1129_v29 }
  0x1e   :  { %1023 = vmatprep.subr.bf16.mxu1 %v1130_v30 }
  0x20   :  { %1002 = vmatpush3.bf16.msra.mxu0 %v1131_v31 }
  0x21   :  { %1024 = vmatpush3.bf16.msra.mxu1 %v1132_v32  ;;  %1031 = vmatprep.subr.bf16.mxu0 %v1134_v35 }
  0x22   :  { %1053 = vmatprep.subr.bf16.mxu1 %v1135_v38 }
  0x23   :  { %634 = vmatmul.mubr.bf16.vlgmr.msra.gmra.mrb[0].mxu0 %v74_v47 }
  0x24   :  { %674 = vmatmul.mubr.bf16.vlgmr.msra.gmra.mrb[0].mxu1 %v76_v48  ;;  %1032 = vmatpush3.bf16.msra.mxu0 %v1136_v46 }
  0x25   :  { %1054 = vmatpush3.bf16.msra.mxu1 %v1137_v49  ;;  %1033 = vmatprep.subr.bf16.mxu0 %v1138_v52 }
  0x26   :  { %1055 = vmatprep.subr.bf16.mxu1 %v1139_v53 }
  0x28   :  { %1034 = vmatpush3.bf16.msra.mxu0 %v1140_v54 }
  0x29   :  { %1056 = vmatpush3.bf16.msra.mxu1 %v1141_v55  ;;  %1035 = vmatprep.subr.bf16.mxu0 %v1142_v56 }
  0x2a   :  { %1057 = vmatprep.subr.bf16.mxu1 %v1143_v57 }
  0x2c   :  { %1036 = vmatpush3.bf16.msra.mxu0 %v1144_v58 }
  0x2d   :  { %1058 = vmatpush3.bf16.msra.mxu1 %v1145_v59  ;;  %1037 = vmatprep.subr.bf16.mxu0 %v1146_v60 }
  0x2e   :  { %1059 = vmatprep.subr.bf16.mxu1 %v1147_v61 }
  0x30   :  { %1038 = vmatpush3.bf16.msra.mxu0 %v1148_v62 }
  0x31   :  { %1060 = vmatpush3.bf16.msra.mxu1 %v1149_v63  ;;  %1039 = vmatprep.subr.bf16.mxu0 %v1150_v0 }
  0x32   :  { %1061 = vmatprep.subr.bf16.mxu1 %v1151_v1 }
  0x34   :  { %1040 = vmatpush3.bf16.msra.mxu0 %v1152_v2 }
  0x35   :  { %1062 = vmatpush3.bf16.msra.mxu1 %v1153_v3  ;;  %1041 = vmatprep.subr.bf16.mxu0 %v1154_v4 }
  0x36   :  { %1063 = vmatprep.subr.bf16.mxu1 %v1155_v5 }
  0x38   :  { %1042 = vmatpush3.bf16.msra.mxu0 %v1156_v6 }
  0x39   :  { %1064 = vmatpush3.bf16.msra.mxu1 %v1157_v7 }
  0x3a   :  { %12 = vsyncpa [#allocation3], 0  ;;  %1043 = vmatprep.subr.bf16.mxu0 %v1158_v8  ;;  %1065 = vmatprep.subr.bf16.mxu1 %v1159_v9  ;;  %v1162_v17 = vld [vmem:[%s1477_s1 + $0x178] sm:$0xff]   ;;  %v79_v19 = vpack.c.bf16 %v64_v15, %v64_v15  ;;  %v65_v20 = vcombine.high %v63_v16, %v63_v16  ;;  %v78_v24 = vpack.c.bf16 %v56_v12, %v56_v12  ;;  %v1167_v26 = vld [vmem:[%s1479_s3] sm:$0xff]   ;;  %v1196_v27 = vmov 0.0   ;;  %s1198_s28 = smov [#allocation2]  }
  0x3b   :  { %v1163_v18 = vld [vmem:[%s1477_s1 + $0x1f8] sm:$0xff]   ;;  %v80_v25 = vpack.c.bf16 %v63_v16, %v63_v16  ;;  %v1168_v28 = vld [vmem:[%s1479_s3 + $0x8] sm:$0xff]   ;;  %vm1197_vm0 = vmmov 0   ;;  %v1169_v29 = vld [vmem:[%s1481_s5] sm:$0xff]   ;;  %vm786_vm1 = vcmask 261120   ;;  %s906_s29 = sshll.u32 %s1198_s28, 4  ;;  %s907_s29 = int_to_ptr.vmem [resolvable:$true] %s906_s29 }
  0x3c   :  { %1044 = vmatpush3.bf16.msra.mxu0 %v1160_v11  ;;  %v1164_v21 = vld [vmem:[%s1477_s1 + $0x138] sm:$0xff]   ;;  %v81_v23 = vpack.c.bf16 %v65_v20, %v65_v20  ;;  %713 = vmatprep.mubr.bf16.mxu0 %v79_v19  ;;  %v914_v32 = vld [vmem:[%s1478_s2] ss:$0 sm:$0xff]  ;;  %v1170_v57 = vld [vmem:[%s1481_s5 + $0x8] sm:$0xff]   ;;  %vm898_vm2 = vcmask 74752   ;;  %p1176_p1 = scmp.lt.s32.totalorder %s907_s29, %s907_s29 }
  0x3d   :  { %1066 = vmatpush3.bf16.msra.mxu1 %v1161_v14  ;;  %v1165_v22 = vld [vmem:[%s1477_s1 + $0x1b8] sm:$0xff]   ;;  %1045 = vmatprep.subr.bf16.mxu0 %v1162_v17  ;;  %v979_v58 = vld [vmem:[%s1480_s4] ss:$0 sm:$0xff]  ;;  %s1171_s4 = scalar_lea.vmem %s907_s29, 32 }
  0x3e   :  { %1067 = vmatprep.subr.bf16.mxu1 %v1163_v18  ;;  %753 = vmatprep.mubr.bf16.mxu1 %v81_v23  ;;  %v983_v2 = vld [vmem:[%s1482_s6] ss:$0 sm:$0xff]  ;;  %p1172_p0 = scmp.ne.s32.totalorder %s907_s29, %s1171_s4  ;;  %p1177_p2 = scmp.lt.s32.totalorder %s1171_s4, %s1171_s4 }
  0x40   :  { %1046 = vmatpush3.bf16.msra.mxu0 %v1164_v21  ;;  %p1178_p3 = por %p1177_p2, %p1176_p1 }
  0x41   :  { %1068 = vmatpush3.bf16.msra.mxu1 %v1165_v22  ;;  %1081 = vmatprep.subr.bf16.mxu0 %v1196_v27 }
  0x42   :  { %1089 = vmatprep.subr.bf16.mxu1 %v1196_v27  ;;  %p1179_p4 = pnand %p1178_p3, %p1172_p0 }
  0x43   :  { %714 = vmatmul.mubr.bf16.vlgmr.msra.gmra.mrb[4].mxu0 %v78_v24 }
  0x44   :  { %754 = vmatmul.mubr.bf16.vlgmr.msra.gmra.mrb[4].mxu1 %v80_v25  ;;  %1082 = vmatpush3.bf16.msra.mxu0 %v1167_v26 }
  0x45   :  { %1083 = vmatprep.subr.bf16.mxu0 %v1196_v27  ;;  %1085 = vmatprep.mubr.msk.bf16.mxu0 %vm1197_vm0, %v1196_v27 }
  0x46   :  { %1093 = vmatprep.mubr.msk.bf16.mxu1 %vm1197_vm0, %v1196_v27  ;;  %1090 = vmatpush3.bf16.msra.mxu1 %v1169_v29 }
  0x47   :  { %1091 = vmatprep.subr.bf16.mxu1 %v1196_v27 }
  0x48   :  { %1084 = vmatpush3.bf16.msra.mxu0 %v1168_v28 }
  0x4a   :  { %1092 = vmatpush3.bf16.msra.mxu1 %v1170_v57 }
  0xf6   :  { %v1003_v30 = vpop.f32.mrb[0].mxu0 }
  0xf7   :  { %v1025_v31 = vpop.f32.mrb[0].mxu1  ;;  %v1004_v33 = vpop.f32.mrb[1].mxu0 }
  0xf8   :  { %v1026_v34 = vpop.f32.mrb[1].mxu1  ;;  %v1005_v35 = vadd.f32 %v1004_v33, %v1003_v30  ;;  %v1006_v37 = vpop.f32.mrb[2].mxu0 }
  0xf9   :  { %v1027_v36 = vadd.f32 %v1026_v34, %v1025_v31  ;;  %v1028_v38 = vpop.f32.mrb[2].mxu1  ;;  %v1007_v39 = vpop.f32.mrb[3].mxu0 }
  0xfa   :  { %v1029_v40 = vpop.f32.mrb[3].mxu1  ;;  %v636_v41 = vadd.f32 %v1005_v35, %v914_v32 }
  0xfc   :  { %v676_v42 = vadd.f32 %v1027_v36, %v636_v41 }
 0x116   :  { %v1047_v43 = vpop.f32.mrb[4].mxu0 }
 0x117   :  { %v1069_v44 = vpop.f32.mrb[4].mxu1  ;;  %v1048_v45 = vpop.f32.mrb[5].mxu0 }
 0x118   :  { %v1070_v46 = vpop.f32.mrb[5].mxu1  ;;  %v1049_v47 = vadd.f32 %v1048_v45, %v1047_v43  ;;  %v1050_v49 = vpop.f32.mrb[6].mxu0 }
 0x119   :  { %v1071_v48 = vadd.f32 %v1070_v46, %v1069_v44  ;;  %v1072_v50 = vpop.f32.mrb[6].mxu1  ;;  %v1051_v51 = vpop.f32.mrb[7].mxu0 }
 0x11a   :  { %v1073_v52 = vpop.f32.mrb[7].mxu1  ;;  %v716_v53 = vadd.f32 %v1049_v47, %v676_v42 }
 0x11c   :  { %v756_v54 = vadd.f32 %v1071_v48, %v716_v53 }
 0x11e   :  { %v761_v55 = vmax.f32 %v756_v54, 0.0 }
 0x120   :  { %v762_v56 = vpack.c.bf16 %v761_v55, %v761_v55 }
 0x122   :  { %1086 = vmatmul.mubr.msk.bf16.vlgmr.msra.gmra.mrb[8].mxu0 %vm786_vm1, %v762_v56 }
 0x1f5   :  { %v824_v59 = vpop.f32.mrb[8].mxu0 }
 0x1f6   :  { %v825_v60 = vadd.f32 %v979_v58, %v824_v59  ;;  %v1087_v61 = vpop.f32.mrb[9].mxu0 }
 0x1f7   :  { %v827_v62 = vpop.f32.mrb[10].mxu0 }
 0x1f8   :  { %v830_v63 = vmax.f32 %v825_v60, 0.0  ;;  %v1088_v0 = vpop.f32.mrb[11].mxu0 }
 0x1fa   :  { %v831_v1 = vpack.c.bf16 %v830_v63, %v830_v63 }
 0x1fc   :  { %1094 = vmatmul.mubr.msk.bf16.vlgmr.msra.gmra.mrb[8].mxu1 %vm786_vm1, %v831_v1 }
 0x2cf   :  { %v892_v3 = vpop.f32.mrb[8].mxu1 }
 0x2d0   :  { %v893_v4 = vadd.f32 %v983_v2, %v892_v3  ;;  %v1095_v5 = vpop.f32.mrb[9].mxu1 }
 0x2d1   :  { %v895_v6 = vpop.f32.mrb[10].mxu1 }
 0x2d2   :  { %v1096_v7 = vpop.f32.mrb[11].mxu1  ;;  %899 = vst.msk [vmem:[#allocation2] sm:$0x3] %vm898_vm2, %v893_v4 }
 0x2d3   :  { %1182 = shalt.err (!%p1179_p4)
}
 0x2d4   :  { %s1183_s6 = scalar_lea.hbm %s1483_s7, 32 }
 0x2d5   :  { %p1184_p5 = scmp.ne.s32.totalorder %s1483_s7, %s1183_s6  ;;  %p1187_p6 = scmp.lt.u32.totalorder %s1183_s6, %s1483_s7 }
 0x2d7   :  { %p1189_p7 = pnand %p1187_p6, %p1184_p5 }
 0x2d9   :  { %1192 = shalt.err (!%p1189_p7)
}
 0x2da   :  { %909 = dma.vmem_to_hbm [thread:$0]  %s907_s29, 32, %s1483_s7, [#allocation3]  }
 0x2db   :  { %1193 = dma.done.wait [#allocation3], 32  }
 0x2dc   :  { %1194 = vsyncadd [#allocation3], 4294967264 }
 0x2dd   :  { %913 = vsyncpa [#allocation3], 1 }

</bundles_post_ra>
